<compile_context>
chip_gen: v7x
topology: tpu7x:2x2x1
jax: 0.10.0
libtpu: 0.0.40
codegen_flags: <defaults>
</compile_context>

<pallas_src>
import functools

import jax
import jax.numpy as jnp
from jax.experimental import pallas as pl
from jax.experimental.pallas import tpu as pltpu


_MAX_SUBLANE_TILE = 256                 # cap on TC (tile of the fused B*C axis)
_VMEM_HEADROOM = 16 * 1024 * 1024       # budget = VMEM capacity - headroom
_SMALL_TILE_BYTES = 2 * 1024 * 1024     # below this, request 3-deep input buffering
_MAX_PAD_FRACTION = 0.25                # pad N to a 128 multiple only if <= 25% extra HBM traffic


def _sublane_multiple(dtype):
    # 32-bit dtypes pack 8 rows per sublane group; bf16/f16 pack 16; int8/fp8 pack 32.
    return max(8, 32 // jnp.dtype(dtype).itemsize)


def _vmem_capacity_bytes():
    try:
        info = pltpu.get_tpu_info()
        cap = int(getattr(info, "vmem_capacity_bytes", 0) or 0)
        if cap > 0:
            return cap
    except Exception:
        pass
    return 64 * 1024 * 1024  # conservative default (v7x per-core VMEM)


def _lowest(dtype):
    dtype = jnp.dtype(dtype)
    if jnp.issubdtype(dtype, jnp.floating):
        return float("-inf")
    return int(jnp.iinfo(dtype).min)


def _acc_dtype(oper, dtype):
    if oper == "max":
        return jnp.dtype(dtype)                 # max is exact in any dtype
    if oper == "mean" or jnp.issubdtype(jnp.dtype(dtype), jnp.floating):
        return jnp.dtype(jnp.float32)           # f32 accumulation for floats / mean
    return jnp.dtype(jnp.int32)                 # exact integer sums


# --------------------------------------------------------------------------- #
# Kernels                                                                      #
# --------------------------------------------------------------------------- #
def _agg_kernel(x_ref, o_ref, *, oper, inv_s, acc_dtype):
    # x_ref: (TC, S, TN); o_ref: (TC, TN). Reduce over axis=1 (the nsample axis).
    x = x_ref[...]
    if oper == "max":
        o_ref[...] = jnp.max(x, axis=1).astype(o_ref.dtype)
    else:
        acc = jnp.sum(x.astype(acc_dtype), axis=1)
        if oper == "mean":
            acc = acc * inv_s                    # constant reciprocal, no divide
        o_ref[...] = acc.astype(o_ref.dtype)


def _agg_acc_kernel(x_ref, o_ref, acc_ref, *, oper, inv_s):
    # S split across the innermost ("arbitrary") grid axis; accumulate in scratch.
    s_idx = pl.program_id(2)

    @pl.when(s_idx == 0)
    def _init():
        if oper == "max":
            acc_ref[...] = jnp.full(acc_ref.shape, _lowest(acc_ref.dtype), acc_ref.dtype)
        else:
            acc_ref[...] = jnp.zeros(acc_ref.shape, acc_ref.dtype)

    x = x_ref[...]                               # (TC, TS, TN)
    if oper == "max":
        # Accumulator stays in the input dtype: exact, half the vreg traffic for bf16.
        acc_ref[...] = jnp.maximum(acc_ref[...], jnp.max(x, axis=1))
    else:
        acc_ref[...] = acc_ref[...] + jnp.sum(x.astype(acc_ref.dtype), axis=1)

    @pl.when(s_idx == pl.num_programs(2) - 1)
    def _finalize():
        r = acc_ref[...]
        if oper == "mean":
            r = r * inv_s
        o_ref[...] = r.astype(o_ref.dtype)


# --------------------------------------------------------------------------- #
# Tile planning                                                                #
# --------------------------------------------------------------------------- #
def _largest_divisor(n, mult, cap):
    """Largest divisor of n that is a multiple of `mult` and <= cap (None if none)."""
    best = None
    d = mult
    limit = min(n, cap)
    while d <= limit:
        if n % d == 0:
            best = d
        d += mult
    return best


def _prev_divisor(n, mult, below):
    """Largest divisor of n that is a multiple of `mult` and < below (None if none)."""
    d = ((below - 1) // mult) * mult
    while d >= mult:
        if n % d == 0:
            return d
        d -= mult
    return None


def _plan_tiles(M, S, N_pad, in_isz, out_isz, acc_isz, sub_mult, budget):
    """Pick (tc, ts, tn). ts is None for the single-pass (no S grid axis) kernel."""
    lane_aligned = (N_pad % 128 == 0)
    tn = N_pad
    if M % sub_mult == 0:
        tc = _largest_divisor(M, sub_mult, _MAX_SUBLANE_TILE) or M
    else:
        tc = M  # full-extent leading block (always legal)

    def tile_bytes(tc_, ts_, tn_):
        # double-buffered input + double-buffered output + accumulator headroom
        return (2 * tc_ * ts_ * tn_ * in_isz
                + 2 * tc_ * tn_ * out_isz
                + tc_ * tn_ * acc_isz)

    # 1) Shrink TC first: keeps full-width contiguous HBM runs and lane-dense stores.
    while tile_bytes(tc, S, tn) > budget and M % sub_mult == 0:
        nxt = _prev_divisor(M, sub_mult, tc)
        if nxt is None:
            break
        tc = nxt

    # 2) Halve TN (keeping a multiple of 128) only as a last resort before splitting S.
    while tile_bytes(tc, S, tn) > budget and lane_aligned and tn % 256 == 0:
        tn //= 2

    if tile_bytes(tc, S, tn) <= budget:
        return tc, None, tn

    # 3) Split the S reduction across the grid. ts must be a packing-legal multiple
    #    and evenly divide S so no padded samples leak into the max/sum.
    ts_cand = (S // sub_mult) * sub_mult
    while ts_cand >= sub_mult:
        if ts_cand < S and S % ts_cand == 0 and tile_bytes(tc, ts_cand, tn) <= budget:
            return tc, ts_cand, tn
        ts_cand -= sub_mult

    # No legal split: fall back to single pass; the caller raises vmem_limit_bytes.
    return tc, None, tn


def _make_in_spec(block_shape, index_map, extra_buffering):
    if extra_buffering and hasattr(pl, "Buffered"):
        try:
            return pl.BlockSpec(block_shape, index_map, pipeline_mode=pl.Buffered(3))
        except TypeError:
            pass
    return pl.BlockSpec(block_shape, index_map)


def _call_reduce(x3, M, S, N_pad, tc, ts, tn, oper, inv_s, acc_dt,
                 vmem_limit, extra_buffering):
    out_shape = jax.ShapeDtypeStruct((M, N_pad), x3.dtype)
    if ts is None:
        grid = (M // tc, N_pad // tn)
        in_specs = [_make_in_spec((tc, S, tn), lambda m, n: (m, 0, n), extra_buffering)]
        out_specs = pl.BlockSpec((tc, tn), lambda m, n: (m, n))
        kernel = functools.partial(_agg_kernel, oper=oper, inv_s=inv_s, acc_dtype=acc_dt)
        scratch_shapes = []
        dims = ("parallel", "parallel")
    else:
        grid = (M // tc, N_pad // tn, S // ts)
        in_specs = [_make_in_spec((tc, ts, tn), lambda m, n, s: (m, s, n), extra_buffering)]
        out_specs = pl.BlockSpec((tc, tn), lambda m, n, s: (m, n))
        kernel = functools.partial(_agg_acc_kernel, oper=oper, inv_s=inv_s)
        scratch_shapes = [pltpu.VMEM((tc, tn), acc_dt)]
        dims = ("parallel", "parallel", "arbitrary")

    return pl.pallas_call(
        kernel,
        out_shape=out_shape,
        grid=grid,
        in_specs=in_specs,
        out_specs=out_specs,
        scratch_shapes=scratch_shapes,
        compiler_params=pltpu.CompilerParams(
            dimension_semantics=dims,
            vmem_limit_bytes=vmem_limit,
        ),
    )(x3)


# --------------------------------------------------------------------------- #
# Public wrapper                                                               #
# --------------------------------------------------------------------------- #
def aggregate(x, oper="max", dim=2, *, tile_budget_bytes=None):
    """Pallas equivalent of Aggregator(oper)(x, dim=2) for 4-D inputs (reduce axis 2)."""
    assert oper in ("mean", "sum", "max")
    assert x.ndim == 4 and dim in (2, -2), "kernel implemented for 4-D input, dim=2"
    B, C, S, N = x.shape
    in_isz = jnp.dtype(x.dtype).itemsize
    out_isz = in_isz
    sub_mult = _sublane_multiple(x.dtype)
    acc_dt = _acc_dtype(oper, x.dtype)
    acc_isz = jnp.dtype(acc_dt).itemsize
    inv_s = 1.0 / float(S)

    capacity = _vmem_capacity_bytes()
    if tile_budget_bytes is None:
        tile_budget_bytes = max(capacity - _VMEM_HEADROOM, 8 * 1024 * 1024)

    # Fuse B and C into one leading axis (free, contiguous reshape).
    M = B * C
    x3 = x.reshape(M, S, N)

    # Lane-dense output: pad N to a multiple of 128 when the extra HBM traffic is
    # small. Padded columns never enter the S-reduction and are sliced off below.
    N_pad = ((N + 127) // 128) * 128
    if N_pad != N and N_pad > N * (1.0 + _MAX_PAD_FRACTION):
        N_pad = N                       # padding too costly: keep full-extent lane block
    if N_pad != N:
        x3 = jnp.pad(x3, ((0, 0), (0, 0), (0, N_pad - N)))

    tc, ts, tn = _plan_tiles(M, S, N_pad, in_isz, out_isz, acc_isz,
                             sub_mult, tile_budget_bytes)

    # v7x has 2 TensorCores: guarantee >= 2 blocks along the parallel axes when legal.
    if (M // tc) * (N_pad // tn) == 1:
        if N_pad % 128 == 0 and tn % 256 == 0:
            tn //= 2
        elif M % sub_mult == 0:
            nxt = _prev_divisor(M, sub_mult, tc)
            if nxt is not None:
                tc = nxt

    ts_eff = S if ts is None else ts
    in_tile_bytes = tc * ts_eff * tn * in_isz
    extra_buffering = in_tile_bytes < _SMALL_TILE_BYTES
    n_in_bufs = 3 if extra_buffering else 2
    tile_bytes = n_in_bufs * in_tile_bytes + 2 * tc * tn * out_isz + tc * tn * acc_isz
    vmem_limit = int(min(max(tile_bytes + (8 << 20), 16 << 20), capacity - (4 << 20)))

    try:
        out = _call_reduce(x3, M, S, N_pad, tc, ts, tn, oper, inv_s, acc_dt,
                           vmem_limit, extra_buffering)
    except Exception:
        if not extra_buffering:
            raise
        # pl.Buffered(3) not supported on this jax/libtpu: retry with default buffering.
        out = _call_reduce(x3, M, S, N_pad, tc, ts, tn, oper, inv_s, acc_dt,
                           vmem_limit, False)

    if N_pad != N:
        out = out[:, :N]
    return out.reshape(B, C, N)


# --------------------------------------------------------------------------- #
# Self-test                                                                    #
# --------------------------------------------------------------------------- #
if __name__ == "__main__":
    key = jax.random.PRNGKey(0)

    def check_float(x, atol, rtol, budget=None):
        xf = x.astype(jnp.float32)
        refs = {
            "mean": jnp.mean(xf, axis=2).astype(x.dtype),
            "sum": jnp.sum(xf, axis=2).astype(x.dtype),
            "max": jnp.max(x, axis=2),
        }
        for oper, ref in refs.items():
            out = jax.block_until_ready(
                aggregate(x, oper=oper, dim=2, tile_budget_bytes=budget))
            assert out.shape == ref.shape, (oper, x.shape, out.shape)
            assert out.dtype == x.dtype, (oper, x.shape, out.dtype)
            assert jnp.allclose(out, ref, atol=atol, rtol=rtol), (oper, x.shape, budget)

    # f32: shapes consistent with DenseEdgeConv's aggregation (B, npoint, knn, C)
    # with knn=16 and C = conv_channels + num_fc_layers*growth_rate = 24 + 3*12 = 60,
    # plus a lane-dense shape and a tiny shape.
    for shape in [(2, 32, 16, 60), (2, 4, 16, 16), (1, 8, 16, 512)]:
        key, sub = jax.random.split(key)
        check_float(jax.random.normal(sub, shape, dtype=jnp.float32), 1e-5, 1e-5)

    # bf16: exercises the 16-row sublane-packing path.
    key, sub = jax.random.split(key)
    check_float(jax.random.normal(sub, (2, 8, 16, 256), dtype=jnp.bfloat16), 1e-2, 1e-2)

    # int32: exact max/sum (f32 widening is gated off for integer inputs).
    key, sub = jax.random.split(key)
    xi = jax.random.randint(sub, (2, 4, 16, 128), -50, 50, dtype=jnp.int32)
    for oper, ref in (("max", jnp.max(xi, axis=2)), ("sum", jnp.sum(xi, axis=2))):
        out = jax.block_until_ready(aggregate(xi, oper=oper, dim=2))
        assert out.dtype == xi.dtype and bool(jnp.array_equal(out, ref)), (oper, "int32")

    # Forced-budget paths: TN halving (lane-aligned shrink) ...
    key, sub = jax.random.split(key)
    check_float(jax.random.normal(sub, (1, 8, 16, 512), dtype=jnp.float32),
                1e-5, 1e-5, budget=300_000)
    # ... and the S-split accumulator kernel (innermost "arbitrary" axis).
    key, sub = jax.random.split(key)
    check_float(jax.random.normal(sub, (2, 8, 32, 128), dtype=jnp.float32),
                1e-5, 1e-5, budget=150_000)

    print("KERNEL_OK")
</pallas_src>

<mosaic_0001>
module attributes {stable_mosaic.version = 11 : i64} {
  func.func @_agg_kernel(%arg0: i32, %arg1: i32, %arg2: memref<32x16x60xf32, #tpu.memory_space<vmem>>, %arg3: memref<32x60xf32, #tpu.memory_space<vmem>>) attributes {dimension_semantics = [#tpu.dimension_semantics<parallel>, #tpu.dimension_semantics<parallel>], iteration_bounds = array<i64: 2, 1>, scalar_prefetch = 0 : i64, scratch_operands = 0 : i64, tpu.core_type = #tpu.core_type<tc>, window_params = [{transform_indices = @transform_0, window_bounds = array<i64: 32, 16, 60>}, {transform_indices = @transform_1, window_bounds = array<i64: 32, 60>}]} {
    %c0 = arith.constant 0 : index
    %c0_0 = arith.constant 0 : index
    %c0_1 = arith.constant 0 : index
    %0 = vector.load %arg2[%c0, %c0_0, %c0_1] : memref<32x16x60xf32, #tpu.memory_space<vmem>>, vector<32x16x60xf32>
    %cst = arith.constant dense<0.000000e+00> : vector<32x60xf32>
    %1 = vector.multi_reduction <add>, %0, %cst [1] : vector<32x16x60xf32> to vector<32x60xf32>
    %cst_2 = arith.constant 6.250000e-02 : f32
    %2 = vector.broadcast %cst_2 : f32 to vector<32x60xf32>
    %3 = arith.mulf %1, %2 : vector<32x60xf32>
    %c0_3 = arith.constant 0 : index
    %c0_4 = arith.constant 0 : index
    %4 = vector.load %arg3[%c0_3, %c0_4] : memref<32x60xf32, #tpu.memory_space<vmem>>, vector<32x60xf32>
    tpu.vector_store %arg3[%c0_3, %c0_4], %3 {strides = array<i32>} : memref<32x60xf32, #tpu.memory_space<vmem>>, vector<32x60xf32>,
    return
  }
  func.func @transform_0(%arg0: i32, %arg1: i32) -> (i32, i32, i32) {
    %c0_i32 = arith.constant 0 : i32
    %c0_i32_0 = arith.constant 0 : i32
    return %arg0, %c0_i32, %arg1 : i32, i32, i32
  }
  func.func @transform_1(%arg0: i32, %arg1: i32) -> (i32, i32) {
    %c0_i32 = arith.constant 0 : i32
    return %arg0, %arg1 : i32, i32
  }
}

</mosaic_0001>

<bundles_post_ra>
// kernel: tpu_custom_call.1
= control target key start
LH: loop header
LB: loop body
LE: loop exit
PB: predicated region body
PF: predicated region fallthrough
CT: control target
= control target key end

     0   :  { %6 = vsyncpa [#allocation3], 0  ;;  %s1235_s0 = inlined_call_operand.vmem [shape: f32[64,16,60], index: 0, kind: input, shape index: {}]   ;;  %s1236_s1 = inlined_call_operand.hbm [shape: f32[64,60], index: 1, kind: output, shape index: {}]  }
   0x1   :  { %8 = vsyncpa [#allocation3 + $0x1], 0  ;;  %s865_s6 = smov 0   ;;  %s867_s7 = smov 0  }
   0x2   :  { %s869_s8 = smov 0   ;;  %s871_s9 = smov 0  }
   0x3   :  { %s873_s10 = smov 0   ;;  %s875_s11 = smov 0  }
   0x4 LB: > { %s699_s12 = sadd.s32 4294967295, %s850_s11   ;;  %s700_s13 = sadd.s32 4294967294, %s850_s11   ;;  %s850_s11 = sphi %s875_s11, %s14_s11   ;;  %s846_s10 = sphi %s873_s10, %s1243_s10   ;;  %s842_s9 = sphi %s871_s9, %s1242_s9   ;;  %s838_s8 = sphi %s869_s8, %s1241_s8   ;;  %s834_s7 = sphi %s867_s7, %s1240_s7   ;;  %s830_s6 = sphi %s865_s6, %s1239_s6  }
   0x5   : > { %s26_s14 = sadd.s32 1, %s846_s10  ;;  %s63_s15 = sadd.s32 1, %s838_s8 }
   0x6   : > { %p28_p0 = scmp.ge.s32.totalorder %s26_s14, 2  ;;  %p73_p1 = scmp.ne.s32.totalorder %s838_s8, %s834_s7 }
   0x7   : > { %p74_p2 = scmp.eq.s32.totalorder %s699_s12, 1  ;;  %p79_p3 = scmp.ne.s32.totalorder %s834_s7, %s830_s6 }
   0x8   : > { %s1245_s14 = smov (%p28_p0, %s26_s14), 0  ;;  %p80_p5 = scmp.eq.s32.totalorder %s700_s13, 1 }
   0x9   : > { %p905_p4 = por %p74_p2, %p73_p1  ;;  %s58_s17 = ssub.s32 %s846_s10, %s1245_s14 }
   0xa   : > { %p703_p6 = scmp.ge.s32.totalorder %s850_s11, 1  ;;  %p61_p7 = scmp.eq.s32.totalorder %s58_s17, 0 }
   0xb   : > { %p912_p8 = por %p80_p5, %p79_p3  ;;  %p111_p9 = scmp.lt.s32.totalorder %s850_s11, 3 }
   0xc   : > { %s918_s19 = scalar_select %p61_p7, %s838_s8, %s63_s15  }
   0xd   : > { %p112_p10 = pnand %p703_p6, %p111_p9 }
   0xe   : > { %s705_s20 = sshll.u32 (!%p112_p10), %s842_s9, 5  ;;  %vm210_vm0 = vcmask (!%p112_p10), 490496   ;;  %vm563_vm1 = vcmask (!%p112_p10), 1041409   ;;  %vm565_vm2 = vcmask (!%p112_p10), 1042434   ;;  %vm567_vm3 = vcmask (!%p112_p10), 1043459   ;;  %s132_s25 = sand.u32 (!%p112_p10), 1, %s834_s7  }
   0xf   : > { %115 = sbr.rel (%p112_p10) target bundleno = 129 (0x81), region = 24  ;;  %p136_p11 = scmp.lt.s32.totalorder (!%p112_p10), %s705_s20, 63  ;;  %vm569_vm4 = vcmask (!%p112_p10), 1044484   ;;  %vm571_vm5 = vcmask (!%p112_p10), 1045509   ;;  %vm573_vm6 = vcmask (!%p112_p10), 1046534   ;;  %vm575_vm7 = vcmask (!%p112_p10), 1047559  }
  0x10   : > { %s1133_s26 = sshll.u32 (!%p112_p10), %s132_s25, 5  ;;  %s714_s27 = sshll.u32 (!%p112_p10), %s842_s9, 9 }
  0x11   : > { %s134_s28 = scalar_lea.vmem (!%p112_p10), [#allocation2], %s1133_s26  ;;  %s1173_s3 = scalar_lea.hbm (!%p112_p10), %s1236_s1, %s714_s27 }
  0x12   : > { %s621_s29 = sshll.u32 (!%p112_p10), %s134_s28, 4  ;;  %s1189_s4 = scalar_lea.sflag (!%p112_p10), [#allocation3], %s132_s25  ;;  %s1175_s29 = int_to_ptr.vmem [resolvable:$true] %s621_s29 }
  0x13   : > { %s772_s5 = scalar_lea.vmem (!%p112_p10), %s1175_s29, 512  ;;  %s852_s9 = smov (!%p112_p10), [#allocation2]  }
  0x14   : > { %p773_p12 = scmp.ne.s32.totalorder (!%p112_p10), %s1175_s29, %s772_s5  ;;  %s776_s12 = sshll.u32 (!%p112_p10), %s852_s9, 4  ;;  %s777_s12 = int_to_ptr.vmem [resolvable:$false] %s776_s12 }
  0x15   : > { %s778_s13 = scalar_lea.vmem (!%p112_p10), %s777_s12, 1024  ;;  %p779_p1 = scmp.lt.s32.totalorder (!%p112_p10), %s1175_s29, %s777_s12 }
  0x16   : > { %s1247_s20 = smov (!%p136_p11, %s705_s20), 63  ;;  %p774_p13 = pnand %p773_p12, %p905_p4 }
  0x17   : > { %s713_s21 = sshll.u32 %s1247_s20, 4  ;;  %p780_p2 = scmp.lt.s32.totalorder %s778_s13, %s772_s5 }
  0x18   : > { %s924_s24 = scalar_lea.vmem %s1235_s0, %s713_s21  ;;  %p775_p0 = pneg %p774_p13 }
  0x19   : > { %v146_v0 = vld [vmem:[%s924_s24] sm:$0xff]  ;;  %v147_v1 = vld [vmem:[%s924_s24 + $0x8] sm:$0xff]  ;;  %v148_v2 = vld [vmem:[%s924_s24 + $0x10] sm:$0xff]  ;;  %p781_p3 = por %p780_p2, %p779_p1 }
  0x1a   : > { %v149_v3 = vld [vmem:[%s924_s24 + $0x18] sm:$0xff]  ;;  %v150_v4 = vld [vmem:[%s924_s24 + $0x20] sm:$0xff]  ;;  %v151_v5 = vld [vmem:[%s924_s24 + $0x28] sm:$0xff]  ;;  %v211_v6 = vsel %vm210_vm0, %v146_v0, 0.0  ;;  %v212_v7 = vsel %vm210_vm0, %v147_v1, 0.0  ;;  %v220_v8 = vsel %vm210_vm0, %v148_v2, 0.0 }
  0x1b   : > { %v152_v9 = vld [vmem:[%s924_s24 + $0x30] sm:$0xff]  ;;  %v153_v10 = vld [vmem:[%s924_s24 + $0x38] sm:$0xff]  ;;  %v154_v11 = vld [vmem:[%s924_s24 + $0x40] sm:$0xff]  ;;  %v213_v12 = vadd.f32 %v212_v7, %v211_v6  ;;  %v221_v13 = vsel %vm210_vm0, %v149_v3, 0.0  ;;  %v229_v14 = vsel %vm210_vm0, %v150_v4, 0.0  ;;  %v230_v15 = vsel %vm210_vm0, %v151_v5, 0.0  ;;  %p782_p5 = pnand %p781_p3, %p775_p0 }
  0x1c   : > { %v155_v16 = vld [vmem:[%s924_s24 + $0x48] sm:$0xff]  ;;  %v156_v17 = vld [vmem:[%s924_s24 + $0x50] sm:$0xff]  ;;  %v157_v18 = vld [vmem:[%s924_s24 + $0x58] sm:$0xff]  ;;  %v222_v19 = vadd.f32 %v221_v13, %v220_v8  ;;  %v231_v20 = vadd.f32 %v230_v15, %v229_v14  ;;  %v238_v21 = vsel %vm210_vm0, %v152_v9, 0.0  ;;  %v239_v22 = vsel %vm210_vm0, %v153_v10, 0.0 }
  0x1d   : > { %v158_v23 = vld [vmem:[%s924_s24 + $0x60] sm:$0xff]  ;;  %v214_v24 = vrot.slane %v213_v12, 4  ;;  %v240_v25 = vadd.f32 %v239_v22, %v238_v21  ;;  %v247_v26 = vsel %vm210_vm0, %v154_v11, 0.0  ;;  %v248_v27 = vsel %vm210_vm0, %v155_v16, 0.0  ;;  %v159_v28 = vld [vmem:[%s924_s24 + $0x68] sm:$0xff]  ;;  %v160_v29 = vld [vmem:[%s924_s24 + $0x70] sm:$0xff] }
  0x1e   : > { %v223_v30 = vrot.slane %v222_v19, 4  ;;  %v232_v31 = vrot.slane %v231_v20, 4  ;;  %v249_v32 = vadd.f32 %v248_v27, %v247_v26  ;;  %v256_v33 = vsel %vm210_vm0, %v156_v17, 0.0  ;;  %v161_v38 = vld [vmem:[%s924_s24 + $0x78] sm:$0xff]  ;;  %v162_v63 = vld [vmem:[%s924_s24 + $0x80] sm:$0xff]  ;;  %v163_v4 = vld [vmem:[%s924_s24 + $0x88] sm:$0xff] }
  0x1f   : > { %v215_v34 = vadd.f32 %v214_v24, %v213_v12  ;;  %v241_v35 = vrot.slane %v240_v25, 4  ;;  %v257_v36 = vsel %vm210_vm0, %v157_v18, 0.0  ;;  %v265_v37 = vsel %vm210_vm0, %v158_v23, 0.0  ;;  %v164_v5 = vld [vmem:[%s924_s24 + $0x90] sm:$0xff]  ;;  %v165_v10 = vld [vmem:[%s924_s24 + $0x98] sm:$0xff]  ;;  %v166_v15 = vld [vmem:[%s924_s24 + $0xa0] sm:$0xff] }
  0x20   : > { %v224_v39 = vadd.f32 %v223_v30, %v222_v19  ;;  %v233_v40 = vadd.f32 %v232_v31, %v231_v20  ;;  %v250_v41 = vrot.slane %v249_v32, 4  ;;  %v258_v42 = vadd.f32 %v257_v36, %v256_v33  ;;  %v167_v16 = vld [vmem:[%s924_s24 + $0xa8] sm:$0xff]  ;;  %v169_v26 = vld [vmem:[%s924_s24 + $0xb8] sm:$0xff]  ;;  %v170_v27 = vld [vmem:[%s924_s24 + $0xc0] sm:$0xff] }
  0x21   : > { %v216_v43 = vrot.slane %v215_v34, 2  ;;  %v242_v44 = vadd.f32 %v241_v35, %v240_v25  ;;  %v266_v45 = vsel %vm210_vm0, %v159_v28, 0.0  ;;  %v274_v46 = vsel %vm210_vm0, %v160_v29, 0.0  ;;  %v168_v25 = vld [vmem:[%s924_s24 + $0xb0] sm:$0xff]  ;;  %v171_v36 = vld [vmem:[%s924_s24 + $0xc8] sm:$0xff] }
  0x22   : > { %v225_v47 = vrot.slane %v224_v39, 2  ;;  %v234_v48 = vrot.slane %v233_v40, 2  ;;  %v251_v49 = vadd.f32 %v250_v41, %v249_v32  ;;  %v259_v50 = vrot.slane %v258_v42, 4 }
  0x23   : > { %v217_v51 = vadd.f32 %v216_v43, %v215_v34  ;;  %v243_v52 = vrot.slane %v242_v44, 2  ;;  %v267_v53 = vadd.f32 %v266_v45, %v265_v37  ;;  %v275_v54 = vsel %vm210_vm0, %v161_v38, 0.0  ;;  %v172_v37 = vld [vmem:[%s924_s24 + $0xd0] sm:$0xff] }
  0x24   : > { %v226_v55 = vadd.f32 %v225_v47, %v224_v39  ;;  %v235_v56 = vadd.f32 %v234_v48, %v233_v40  ;;  %v252_v57 = vrot.slane %v251_v49, 2  ;;  %v260_v58 = vadd.f32 %v259_v50, %v258_v42  ;;  %v174_v47 = vld [vmem:[%s924_s24 + $0xe0] sm:$0xff] }
  0x25   : > { %v218_v59 = vrot.slane %v217_v51, 1  ;;  %v244_v60 = vadd.f32 %v243_v52, %v242_v44  ;;  %v268_v61 = vrot.slane %v267_v53, 4  ;;  %v276_v62 = vadd.f32 %v275_v54, %v274_v46  ;;  %v173_v46 = vld [vmem:[%s924_s24 + $0xd8] sm:$0xff] }
  0x26   : > { %v227_v0 = vrot.slane %v226_v55, 1  ;;  %v236_v1 = vrot.slane %v235_v56, 1  ;;  %v253_v2 = vadd.f32 %v252_v57, %v251_v49  ;;  %v261_v3 = vrot.slane %v260_v58, 2  ;;  %v176_v57 = vld [vmem:[%s924_s24 + $0xf0] sm:$0xff] }
  0x27   : > { %v961_v6 = vadd.f32 %v218_v59, %v217_v51  ;;  %v245_v7 = vrot.slane %v244_v60, 1  ;;  %v269_v8 = vadd.f32 %v268_v61, %v267_v53  ;;  %v277_v9 = vrot.slane %v276_v62, 4 }
  0x28   : > { %v964_v11 = vadd.f32 %v227_v0, %v226_v55  ;;  %v966_v12 = vadd.f32 %v236_v1, %v235_v56  ;;  %v254_v13 = vrot.slane %v253_v2, 1  ;;  %v262_v14 = vadd.f32 %v261_v3, %v260_v58  ;;  %v175_v56 = vld [vmem:[%s924_s24 + $0xe8] sm:$0xff] }
  0x29   : > { %v970_v17 = vadd.f32 %v245_v7, %v244_v60  ;;  %v270_v18 = vrot.slane %v269_v8, 2  ;;  %v278_v19 = vadd.f32 %v277_v9, %v276_v62  ;;  %v283_v20 = vsel %vm210_vm0, %v162_v63, 0.0 }
  0x2a   : > { %v973_v21 = vadd.f32 %v254_v13, %v253_v2  ;;  %v263_v22 = vrot.slane %v262_v14, 1  ;;  %v284_v23 = vsel %vm210_vm0, %v163_v4, 0.0  ;;  %v292_v24 = vsel %vm210_vm0, %v164_v5, 0.0  ;;  %v177_v2 = vld [vmem:[%s924_s24 + $0xf8] sm:$0xff] }
  0x2b   : > { %v271_v28 = vadd.f32 %v270_v18, %v269_v8  ;;  %v279_v29 = vrot.slane %v278_v19, 2  ;;  %v285_v30 = vadd.f32 %v284_v23, %v283_v20  ;;  %v293_v31 = vsel %vm210_vm0, %v165_v10, 0.0 }
  0x2c   : > { %v981_v32 = vadd.f32 %v263_v22, %v262_v14  ;;  %v294_v33 = vadd.f32 %v293_v31, %v292_v24  ;;  %v301_v34 = vsel %vm210_vm0, %v166_v15, 0.0  ;;  %v302_v35 = vsel %vm210_vm0, %v167_v16, 0.0 }
  0x2d   : > { %v272_v38 = vrot.slane %v271_v28, 1  ;;  %v280_v39 = vadd.f32 %v279_v29, %v278_v19  ;;  %v286_v40 = vrot.slane %v285_v30, 4  ;;  %v303_v41 = vadd.f32 %v302_v35, %v301_v34  ;;  %v178_v19 = vld [vmem:[%s924_s24 + $0x100] sm:$0xff] }
  0x2e   : > { %v295_v42 = vrot.slane %v294_v33, 4  ;;  %v310_v43 = vsel %vm210_vm0, %v168_v25, 0.0  ;;  %v311_v44 = vsel %vm210_vm0, %v169_v26, 0.0  ;;  %v319_v45 = vsel %vm210_vm0, %v170_v27, 0.0  ;;  %v179_v25 = vld [vmem:[%s924_s24 + $0x108] sm:$0xff] }
  0x2f   : > { %v992_v48 = vadd.f32 %v272_v38, %v271_v28  ;;  %v281_v49 = vrot.slane %v280_v39, 1  ;;  %v287_v50 = vadd.f32 %v286_v40, %v285_v30  ;;  %v304_v51 = vrot.slane %v303_v41, 4  ;;  %v180_v30 = vld [vmem:[%s924_s24 + $0x110] sm:$0xff] }
  0x30   : > { %v296_v52 = vadd.f32 %v295_v42, %v294_v33  ;;  %v312_v53 = vadd.f32 %v311_v44, %v310_v43  ;;  %v320_v54 = vsel %vm210_vm0, %v171_v36, 0.0  ;;  %v328_v55 = vsel %vm210_vm0, %v172_v37, 0.0  ;;  %v181_v36 = vld [vmem:[%s924_s24 + $0x118] sm:$0xff] }
  0x31   : > { %v998_v58 = vadd.f32 %v281_v49, %v280_v39  ;;  %v288_v59 = vrot.slane %v287_v50, 2  ;;  %v305_v60 = vadd.f32 %v304_v51, %v303_v41  ;;  %v321_v61 = vadd.f32 %v320_v54, %v319_v45  ;;  %v182_v45 = vld [vmem:[%s924_s24 + $0x120] sm:$0xff] }
  0x32   : > { %v297_v62 = vrot.slane %v296_v52, 2  ;;  %v313_v63 = vrot.slane %v312_v53, 4  ;;  %v329_v0 = vsel %vm210_vm0, %v173_v46, 0.0  ;;  %v337_v1 = vsel %vm210_vm0, %v174_v47, 0.0  ;;  %v183_v46 = vld [vmem:[%s924_s24 + $0x128] sm:$0xff] }
  0x33   : > { %v289_v3 = vadd.f32 %v288_v59, %v287_v50  ;;  %v306_v4 = vrot.slane %v305_v60, 2  ;;  %v322_v5 = vrot.slane %v321_v61, 4  ;;  %v330_v7 = vadd.f32 %v329_v0, %v328_v55 }
  0x34   : > { %v298_v8 = vadd.f32 %v297_v62, %v296_v52  ;;  %v314_v9 = vadd.f32 %v313_v63, %v312_v53  ;;  %v338_v10 = vsel %vm210_vm0, %v175_v56, 0.0  ;;  %v346_v13 = vsel %vm210_vm0, %v176_v57, 0.0  ;;  %v184_v56 = vld [vmem:[%s924_s24 + $0x130] sm:$0xff]  ;;  %v185_v57 = vld [vmem:[%s924_s24 + $0x138] sm:$0xff] }
  0x35   : > { %v290_v14 = vrot.slane %v289_v3, 1  ;;  %v307_v15 = vadd.f32 %v306_v4, %v305_v60  ;;  %v323_v16 = vadd.f32 %v322_v5, %v321_v61  ;;  %v331_v18 = vrot.slane %v330_v7, 4  ;;  %v187_v4 = vld [vmem:[%s924_s24 + $0x148] sm:$0xff] }
  0x36   : > { %v299_v20 = vrot.slane %v298_v8, 1  ;;  %v315_v22 = vrot.slane %v314_v9, 2  ;;  %v339_v23 = vadd.f32 %v338_v10, %v337_v1  ;;  %v347_v24 = vsel %vm210_vm0, %v177_v2, 0.0 }
  0x37   : > { %v1008_v26 = vadd.f32 %v290_v14, %v289_v3  ;;  %v308_v27 = vrot.slane %v307_v15, 1  ;;  %v324_v28 = vrot.slane %v323_v16, 2  ;;  %v332_v29 = vadd.f32 %v331_v18, %v330_v7  ;;  %v186_v3 = vld [vmem:[%s924_s24 + $0x140] sm:$0xff]  ;;  %v189_v18 = vld [vmem:[%s924_s24 + $0x158] sm:$0xff] }
  0x38   : > { %v1011_v31 = vadd.f32 %v299_v20, %v298_v8  ;;  %v316_v33 = vadd.f32 %v315_v22, %v314_v9  ;;  %v340_v34 = vrot.slane %v339_v23, 4  ;;  %v348_v35 = vadd.f32 %v347_v24, %v346_v13 }
  0x39   : > { %v1014_v37 = vadd.f32 %v308_v27, %v307_v15  ;;  %v325_v38 = vadd.f32 %v324_v28, %v323_v16  ;;  %v333_v39 = vrot.slane %v332_v29, 2  ;;  %v355_v40 = vsel %vm210_vm0, %v178_v19, 0.0  ;;  %v188_v16 = vld [vmem:[%s924_s24 + $0x150] sm:$0xff] }
  0x3a   : > { %v317_v41 = vrot.slane %v316_v33, 1  ;;  %v341_v42 = vadd.f32 %v340_v34, %v339_v23  ;;  %v349_v43 = vrot.slane %v348_v35, 4  ;;  %v356_v44 = vsel %vm210_vm0, %v179_v25, 0.0 }
  0x3b   : > { %v326_v47 = vrot.slane %v325_v38, 1  ;;  %v334_v49 = vadd.f32 %v333_v39, %v332_v29  ;;  %v357_v50 = vadd.f32 %v356_v44, %v355_v40  ;;  %v364_v51 = vsel %vm210_vm0, %v180_v30, 0.0  ;;  %v190_v29 = vld [vmem:[%s924_s24 + $0x160] sm:$0xff]  ;;  %v191_v30 = vld [vmem:[%s924_s24 + $0x168] sm:$0xff] }
  0x3c   : > { %v1021_v52 = vadd.f32 %v317_v41, %v316_v33  ;;  %v342_v53 = vrot.slane %v341_v42, 2  ;;  %v350_v54 = vadd.f32 %v349_v43, %v348_v35  ;;  %v365_v55 = vsel %vm210_vm0, %v181_v36, 0.0 }
  0x3d   : > { %v1026_v59 = vadd.f32 %v326_v47, %v325_v38  ;;  %v335_v60 = vrot.slane %v334_v49, 1  ;;  %v358_v61 = vrot.slane %v357_v50, 4  ;;  %v366_v62 = vadd.f32 %v365_v55, %v364_v51  ;;  %v193_v47 = vld [vmem:[%s924_s24 + $0x178] sm:$0xff] }
  0x3e   : > { %v343_v63 = vadd.f32 %v342_v53, %v341_v42  ;;  %v351_v0 = vrot.slane %v350_v54, 2  ;;  %v373_v1 = vsel %vm210_vm0, %v182_v45, 0.0  ;;  %v374_v2 = vsel %vm210_vm0, %v183_v46, 0.0  ;;  %v192_v42 = vld [vmem:[%s924_s24 + $0x170] sm:$0xff] }
  0x3f   : > { %v1032_v5 = vadd.f32 %v335_v60, %v334_v49  ;;  %v359_v7 = vadd.f32 %v358_v61, %v357_v50  ;;  %v367_v8 = vrot.slane %v366_v62, 4  ;;  %v375_v9 = vadd.f32 %v374_v2, %v373_v1  ;;  %v194_v60 = vld [vmem:[%s924_s24 + $0x180] sm:$0xff]  ;;  %v195_v61 = vld [vmem:[%s924_s24 + $0x188] sm:$0xff] }
  0x40   : > { %v344_v10 = vrot.slane %v343_v63, 1  ;;  %v352_v13 = vadd.f32 %v351_v0, %v350_v54  ;;  %v382_v14 = vsel %vm210_vm0, %v184_v56, 0.0  ;;  %v383_v15 = vsel %vm210_vm0, %v185_v57, 0.0 }
  0x41   : > { %v360_v19 = vrot.slane %v359_v7, 2  ;;  %v368_v20 = vadd.f32 %v367_v8, %v366_v62  ;;  %v376_v22 = vrot.slane %v375_v9, 4  ;;  %v384_v23 = vadd.f32 %v383_v15, %v382_v14  ;;  %v196_v8 = vld [vmem:[%s924_s24 + $0x190] sm:$0xff] }
  0x42   : > { %v1038_v24 = vadd.f32 %v344_v10, %v343_v63  ;;  %v353_v25 = vrot.slane %v352_v13, 1  ;;  %v391_v27 = vsel %vm210_vm0, %v186_v3, 0.0  ;;  %v392_v28 = vsel %vm210_vm0, %v187_v4, 0.0 }
  0x43   : > { %v361_v33 = vadd.f32 %v360_v19, %v359_v7  ;;  %v369_v34 = vrot.slane %v368_v20, 2  ;;  %v377_v35 = vadd.f32 %v376_v22, %v375_v9  ;;  %v385_v36 = vrot.slane %v384_v23, 4  ;;  %v197_v9 = vld [vmem:[%s924_s24 + $0x198] sm:$0xff]  ;;  %v198_v22 = vld [vmem:[%s924_s24 + $0x1a0] sm:$0xff] }
  0x44   : > { %v1044_v38 = vadd.f32 %v353_v25, %v352_v13  ;;  %v393_v39 = vadd.f32 %v392_v28, %v391_v27  ;;  %v400_v40 = vsel %vm210_vm0, %v188_v16, 0.0  ;;  %v401_v41 = vsel %vm210_vm0, %v189_v18, 0.0 }
  0x45   : > { %v362_v43 = vrot.slane %v361_v33, 1  ;;  %v370_v44 = vadd.f32 %v369_v34, %v368_v20  ;;  %v378_v45 = vrot.slane %v377_v35, 2  ;;  %v386_v46 = vadd.f32 %v385_v36, %v384_v23  ;;  %v199_v23 = vld [vmem:[%s924_s24 + $0x1a8] sm:$0xff]  ;;  %v200_v36 = vld [vmem:[%s924_s24 + $0x1b0] sm:$0xff] }
  0x46   : > { %v394_v49 = vrot.slane %v393_v39, 4  ;;  %v402_v50 = vadd.f32 %v401_v41, %v400_v40  ;;  %v409_v51 = vsel %vm210_vm0, %v190_v29, 0.0  ;;  %v410_v53 = vsel %vm210_vm0, %v191_v30, 0.0 }
  0x47   : > { %v1052_v54 = vadd.f32 %v362_v43, %v361_v33  ;;  %v371_v55 = vrot.slane %v370_v44, 1  ;;  %v379_v56 = vadd.f32 %v378_v45, %v377_v35  ;;  %v387_v57 = vrot.slane %v386_v46, 2  ;;  %v201_v43 = vld [vmem:[%s924_s24 + $0x1b8] sm:$0xff] }
  0x48   : > { %v395_v62 = vadd.f32 %v394_v49, %v393_v39  ;;  %v403_v63 = vrot.slane %v402_v50, 4  ;;  %v411_v0 = vadd.f32 %v410_v53, %v409_v51  ;;  %v418_v1 = vsel %vm210_vm0, %v192_v42, 0.0 }
  0x49   : > { %v1057_v2 = vadd.f32 %v371_v55, %v370_v44  ;;  %v380_v3 = vrot.slane %v379_v56, 1  ;;  %v388_v4 = vadd.f32 %v387_v57, %v386_v46  ;;  %v419_v7 = vsel %vm210_vm0, %v193_v47, 0.0  ;;  %v202_v55 = vld [vmem:[%s924_s24 + $0x1c0] sm:$0xff] }
  0x4a   : > { %v396_v10 = vrot.slane %v395_v62, 2  ;;  %v404_v13 = vadd.f32 %v403_v63, %v402_v50  ;;  %v412_v14 = vrot.slane %v411_v0, 4  ;;  %v420_v15 = vadd.f32 %v419_v7, %v418_v1  ;;  %v205_v7 = vld [vmem:[%s924_s24 + $0x1d8] sm:$0xff] }
  0x4b   : > { %v1062_v16 = vadd.f32 %v380_v3, %v379_v56  ;;  %v389_v18 = vrot.slane %v388_v4, 1  ;;  %v427_v19 = vsel %vm210_vm0, %v194_v60, 0.0  ;;  %v428_v20 = vsel %vm210_vm0, %v195_v61, 0.0  ;;  %v203_v56 = vld [vmem:[%s924_s24 + $0x1c8] sm:$0xff] }
  0x4c   : > { %v397_v25 = vadd.f32 %v396_v10, %v395_v62  ;;  %v405_v27 = vrot.slane %v404_v13, 2  ;;  %v413_v28 = vadd.f32 %v412_v14, %v411_v0  ;;  %v421_v29 = vrot.slane %v420_v15, 4 }
  0x4d   : > { %v1068_v30 = vadd.f32 %v389_v18, %v388_v4  ;;  %v429_v33 = vadd.f32 %v428_v20, %v427_v19  ;;  %v436_v34 = vsel %vm210_vm0, %v196_v8, 0.0  ;;  %v437_v35 = vsel %vm210_vm0, %v197_v9, 0.0  ;;  %v204_v4 = vld [vmem:[%s924_s24 + $0x1d0] sm:$0xff]  ;;  %v206_v20 = vld [vmem:[%s924_s24 + $0x1e0] sm:$0xff] }
  0x4e   : > { %v398_v39 = vrot.slane %v397_v25, 1  ;;  %v406_v40 = vadd.f32 %v405_v27, %v404_v13  ;;  %v414_v41 = vrot.slane %v413_v28, 2  ;;  %v422_v42 = vadd.f32 %v421_v29, %v420_v15 }
  0x4f   : > { %v430_v44 = vrot.slane %v429_v33, 4  ;;  %v438_v45 = vadd.f32 %v437_v35, %v436_v34  ;;  %v445_v46 = vsel %vm210_vm0, %v198_v22, 0.0  ;;  %v446_v47 = vsel %vm210_vm0, %v199_v23, 0.0  ;;  %v207_v22 = vld [vmem:[%s924_s24 + $0x1e8] sm:$0xff] }
  0x50   : > { %v1076_v49 = vadd.f32 %v398_v39, %v397_v25  ;;  %v407_v50 = vrot.slane %v406_v40, 1  ;;  %v415_v51 = vadd.f32 %v414_v41, %v413_v28  ;;  %v423_v53 = vrot.slane %v422_v42, 2 }
  0x51   : > { %v431_v57 = vadd.f32 %v430_v44, %v429_v33  ;;  %v439_v60 = vrot.slane %v438_v45, 4  ;;  %v447_v61 = vadd.f32 %v446_v47, %v445_v46  ;;  %v454_v62 = vsel %vm210_vm0, %v200_v36, 0.0  ;;  %v208_v36 = vld [vmem:[%s924_s24 + $0x1f0] sm:$0xff] }
  0x52   : > { %v1081_v63 = vadd.f32 %v407_v50, %v406_v40  ;;  %v416_v0 = vrot.slane %v415_v51, 1  ;;  %v424_v1 = vadd.f32 %v423_v53, %v422_v42  ;;  %v455_v3 = vsel %vm210_vm0, %v201_v43, 0.0  ;;  %v209_v43 = vld [vmem:[%s924_s24 + $0x1f8] sm:$0xff] }
  0x53   : > { %v432_v8 = vrot.slane %v431_v57, 2  ;;  %v440_v9 = vadd.f32 %v439_v60, %v438_v45  ;;  %v448_v10 = vrot.slane %v447_v61, 4  ;;  %v456_v13 = vadd.f32 %v455_v3, %v454_v62 }
  0x54   : > { %v1086_v14 = vadd.f32 %v416_v0, %v415_v51  ;;  %v425_v15 = vrot.slane %v424_v1, 1  ;;  %v463_v18 = vsel %vm210_vm0, %v202_v55, 0.0  ;;  %v464_v19 = vsel %vm210_vm0, %v203_v56, 0.0 }
  0x55   : > { %v433_v23 = vadd.f32 %v432_v8, %v431_v57  ;;  %v441_v25 = vrot.slane %v440_v9, 2  ;;  %v449_v27 = vadd.f32 %v448_v10, %v447_v61  ;;  %v457_v28 = vrot.slane %v456_v13, 4 }
  0x56   : > { %v1092_v29 = vadd.f32 %v425_v15, %v424_v1  ;;  %v465_v33 = vadd.f32 %v464_v19, %v463_v18  ;;  %v472_v34 = vsel %vm210_vm0, %v204_v4, 0.0  ;;  %v473_v35 = vsel %vm210_vm0, %v205_v7, 0.0 }
  0x57   : > { %v434_v39 = vrot.slane %v433_v23, 1  ;;  %v442_v40 = vadd.f32 %v441_v25, %v440_v9  ;;  %v450_v41 = vrot.slane %v449_v27, 2  ;;  %v458_v42 = vadd.f32 %v457_v28, %v456_v13 }
  0x58   : > { %v466_v44 = vrot.slane %v465_v33, 4  ;;  %v474_v45 = vadd.f32 %v473_v35, %v472_v34  ;;  %v481_v46 = vsel %vm210_vm0, %v206_v20, 0.0  ;;  %v482_v47 = vsel %vm210_vm0, %v207_v22, 0.0 }
  0x59   : > { %v1100_v50 = vadd.f32 %v434_v39, %v433_v23  ;;  %v443_v51 = vrot.slane %v442_v40, 1  ;;  %v451_v53 = vadd.f32 %v450_v41, %v449_v27  ;;  %v459_v55 = vrot.slane %v458_v42, 2 }
  0x5a   : > { %v467_v56 = vadd.f32 %v466_v44, %v465_v33  ;;  %v475_v57 = vrot.slane %v474_v45, 4  ;;  %v483_v60 = vadd.f32 %v482_v47, %v481_v46  ;;  %v490_v61 = vsel %vm210_vm0, %v208_v36, 0.0 }
  0x5b   : > { %v444_v62 = vadd.f32 %v443_v51, %v442_v40  ;;  %v452_v0 = vrot.slane %v451_v53, 1  ;;  %v460_v1 = vadd.f32 %v459_v55, %v458_v42  ;;  %v491_v3 = vsel %vm210_vm0, %v209_v43, 0.0 }
  0x5c   : > { %v468_v4 = vrot.slane %v467_v56, 2  ;;  %v476_v7 = vadd.f32 %v475_v57, %v474_v45  ;;  %v484_v8 = vrot.slane %v483_v60, 4  ;;  %v492_v9 = vadd.f32 %v491_v3, %v490_v61 }
  0x5d   : > { %v453_v10 = vadd.f32 %v452_v0, %v451_v53  ;;  %v461_v13 = vrot.slane %v460_v1, 1  ;;  %v499_v15 = vmul.f32 0.0625, %v961_v6  ;;  %v500_v18 = vmul.f32 0.0625, %v964_v11 }
  0x5e   : > { %v469_v19 = vadd.f32 %v468_v4, %v467_v56  ;;  %v477_v20 = vrot.slane %v476_v7, 2  ;;  %v485_v22 = vadd.f32 %v484_v8, %v483_v60  ;;  %v493_v23 = vrot.slane %v492_v9, 4 }
  0x5f   : > { %v462_v25 = vadd.f32 %v461_v13, %v460_v1  ;;  %v501_v27 = vmul.f32 0.0625, %v966_v12  ;;  %v502_v28 = vmul.f32 0.0625, %v970_v17  ;;  %v1109_v33 = vmul.f32 0.0625, %v973_v21 }
  0x60   : > { %v470_v34 = vrot.slane %v469_v19, 1  ;;  %v478_v35 = vadd.f32 %v477_v20, %v476_v7  ;;  %v486_v36 = vrot.slane %v485_v22, 2  ;;  %v494_v6 = vadd.f32 %v493_v23, %v492_v9 }
  0x61   : > { %v1112_v11 = vmul.f32 0.0625, %v981_v32  ;;  %v1115_v39 = vmul.f32 0.0625, %v992_v48  ;;  %v1118_v12 = vmul.f32 0.0625, %v998_v58  ;;  %v507_v17 = vmul.f32 0.0625, %v1008_v26 }
  0x62   : > { %v471_v21 = vadd.f32 %v470_v34, %v469_v19  ;;  %v479_v40 = vrot.slane %v478_v35, 1  ;;  %v487_v41 = vadd.f32 %v486_v36, %v485_v22  ;;  %v495_v42 = vrot.slane %v494_v6, 2 }
  0x63   : > { %v508_v43 = vmul.f32 0.0625, %v1011_v31  ;;  %v509_v32 = vmul.f32 0.0625, %v1014_v37  ;;  %v510_v48 = vmul.f32 0.0625, %v1021_v52  ;;  %v511_v44 = vmul.f32 0.0625, %v1026_v59 }
  0x64   : > { %v480_v58 = vadd.f32 %v479_v40, %v478_v35  ;;  %v488_v45 = vrot.slane %v487_v41, 1  ;;  %v496_v26 = vadd.f32 %v495_v42, %v494_v6  ;;  %v512_v46 = vmul.f32 0.0625, %v1032_v5 }
  0x65   : > { %v513_v47 = vmul.f32 0.0625, %v1038_v24  ;;  %v514_v51 = vmul.f32 0.0625, %v1044_v38  ;;  %v515_v53 = vmul.f32 0.0625, %v1052_v54  ;;  %v516_v31 = vmul.f32 0.0625, %v1057_v2 }
  0x66   : > { %v489_v37 = vadd.f32 %v488_v45, %v487_v41  ;;  %v497_v52 = vrot.slane %v496_v26, 1  ;;  %v517_v59 = vmul.f32 0.0625, %v1062_v16  ;;  %v518_v55 = vmul.f32 0.0625, %v1068_v30 }
  0x67   : > { %v519_v5 = vmul.f32 0.0625, %v1076_v49  ;;  %v520_v24 = vmul.f32 0.0625, %v1081_v63  ;;  %v521_v38 = vmul.f32 0.0625, %v1086_v14  ;;  %v522_v54 = vmul.f32 0.0625, %v1092_v29 }
  0x68   : > { %v498_v56 = vadd.f32 %v497_v52, %v496_v26  ;;  %v523_v2 = vmul.f32 0.0625, %v1100_v50  ;;  %v524_v57 = vmul.f32 0.0625, %v444_v62  ;;  %v525_v60 = vmul.f32 0.0625, %v453_v10 }
  0x69   : > { %v526_v61 = vmul.f32 0.0625, %v462_v25  ;;  %v527_v0 = vmul.f32 0.0625, %v471_v21  ;;  %v528_v16 = vmul.f32 0.0625, %v480_v58  ;;  %v529_v1 = vmul.f32 0.0625, %v489_v37 }
  0x6a   : > { %v530_v30 = vmul.f32 0.0625, %v498_v56  ;;  %v564_v49 = vsel %vm563_vm1, %v500_v18, %v499_v15  ;;  %v577_v63 = vsel %vm563_vm1, %v508_v43, %v507_v17  ;;  %v584_v14 = vsel %vm563_vm1, %v516_v31, %v515_v53 }
  0x6b   : > { %v566_v29 = vsel %vm565_vm2, %v501_v27, %v564_v49  ;;  %v578_v3 = vsel %vm565_vm2, %v509_v32, %v577_v63  ;;  %v585_v50 = vsel %vm565_vm2, %v517_v59, %v584_v14  ;;  %v591_v62 = vsel %vm563_vm1, %v524_v57, %v523_v2 }
  0x6c   : > { %v568_v4 = vsel %vm567_vm3, %v502_v28, %v566_v29  ;;  %v579_v7 = vsel %vm567_vm3, %v510_v48, %v578_v3  ;;  %v586_v8 = vsel %vm567_vm3, %v518_v55, %v585_v50  ;;  %v592_v9 = vsel %vm565_vm2, %v525_v60, %v591_v62 }
  0x6d   : > { %v570_v10 = vsel %vm569_vm4, %v1109_v33, %v568_v4  ;;  %v580_v13 = vsel %vm569_vm4, %v511_v44, %v579_v7  ;;  %v587_v15 = vsel %vm569_vm4, %v519_v5, %v586_v8  ;;  %v593_v18 = vsel %vm567_vm3, %v526_v61, %v592_v9 }
  0x6e   : > { %v572_v19 = vsel %vm571_vm5, %v1112_v11, %v570_v10  ;;  %v581_v20 = vsel %vm571_vm5, %v512_v46, %v580_v13  ;;  %v588_v22 = vsel %vm571_vm5, %v520_v24, %v587_v15  ;;  %v594_v23 = vsel %vm569_vm4, %v527_v0, %v593_v18 }
  0x6f   : > { %v574_v25 = vsel %vm573_vm6, %v1115_v39, %v572_v19  ;;  %v582_v27 = vsel %vm573_vm6, %v513_v47, %v581_v20  ;;  %v589_v28 = vsel %vm573_vm6, %v521_v38, %v588_v22  ;;  %v595_v33 = vsel %vm571_vm5, %v528_v16, %v594_v23 }
  0x70   : > { %v576_v34 = vsel %vm575_vm7, %v1118_v12, %v574_v25  ;;  %v583_v35 = vsel %vm575_vm7, %v514_v51, %v582_v27  ;;  %v590_v36 = vsel %vm575_vm7, %v522_v54, %v589_v28  ;;  %v596_v6 = vsel %vm573_vm6, %v529_v1, %v595_v33 }
  0x71   : > { %v597_v11 = vsel %vm575_vm7, %v530_v30, %v596_v6  ;;  %602 = vst.msk [vmem:[%s134_s28] sm:$0xff] %vm210_vm0, %v576_v34  ;;  %603 = vst.msk [vmem:[%s134_s28 + $0x8] sm:$0xff] %vm210_vm0, %v583_v35 }
  0x72   : > { %604 = vst.msk [vmem:[%s134_s28 + $0x10] sm:$0xff] %vm210_vm0, %v590_v36  ;;  %605 = vst.msk [vmem:[%s134_s28 + $0x18] sm:$0xff] %vm210_vm0, %v597_v11 }
  0x73   : > { %785 = shalt.err (!%p782_p5)
}
  0x74   : > { %s786_s15 = scalar_lea.hbm %s1173_s3, 512  ;;  %s790_s21 = scalar_lea.hbm %s1236_s1, 1024 }
  0x75   : > { %p787_p6 = scmp.ne.s32.totalorder %s1173_s3, %s786_s15  ;;  %p791_p10 = scmp.lt.u32.totalorder %s1173_s3, %s1236_s1 }
  0x76   : > { %p792_p11 = scmp.lt.u32.totalorder %s790_s21, %s786_s15  ;;  %p794_p13 = scmp.lt.u32.totalorder %s786_s15, %s1173_s3 }
  0x77   : > { %p788_p7 = pnand %p787_p6, %p905_p4 }
  0x78   : > { %p793_p12 = por %p792_p11, %p791_p10 }
  0x79   : > { %p789_p9 = pneg %p788_p7 }
  0x7a   : > { %p795_p0 = por %p794_p13, %p793_p12 }
  0x7c   : > { %p796_p1 = pnand %p795_p0, %p789_p9 }
  0x7e   : > { %799 = shalt.err (!%p796_p1)
}
  0x7f   : > { %s853_s24 = smov 128   ;;  %s854_s25 = smov 8  }
  0x80   : > { %715 = dma.vmem_to_hbm [thread:$0]  (%p905_p4), %s1175_s29, 512, %s1173_s3, %s1189_s4, %s853_s24, %s853_s24, %s854_s25  }
  0x81 PF: > { %p721_p2 = scmp.ge.s32.totalorder %s850_s11, 2  ;;  %s636_s26 = sand.u32 1, %s830_s6  }
  0x82   : > { %s637_s27 = scalar_lea.sflag [#allocation3], %s636_s26 }
  0x83   : > { %p718_p3 = pnand %p721_p2, %p912_p8 }
  0x85   : > { %825 = dma.done.wait (!%p718_p3), %s637_s27, 512  }
  0x86   : > { %827 = vsyncadd (!%p718_p3), %s637_s27, 4294966784  ;;  %s14_s11 = sadd.s32 1, %s850_s11   ;;  %s1239_s6 = smov %s834_s7 }
  0x87   : > { %p11_p5 = scmp.ge.s32.totalorder %s14_s11, 4   ;;  %s1240_s7 = smov %s838_s8 }
  0x88   : > { %s1241_s8 = smov %s918_s19  ;;  %s1242_s9 = smov %s846_s10 }
  0x89   : > { %s1243_s10 = smov %s1245_s14  ;;  %13 = sbr.rel (!%p11_p5) target bundleno = 4 (0x4), region = 59 }
  0x90   :  { %642 = vsyncpa [#allocation3], 1 }
  0x91   :  { %644 = vsyncpa [#allocation3 + $0x1], 1 }

</bundles_post_ra>
